<compile_context>
chip_gen: v7x
topology: tpu7x:2x2x1
jax: 0.10.0
libtpu: 0.0.40
codegen_flags: <defaults>
</compile_context>

<pallas_src>
import math
import functools

import jax
import jax.numpy as jnp
from jax.experimental import pallas as pl
from jax.experimental.pallas import tpu as pltpu


_ROW_TILE = 1024          # tm target (multiple of 256 -> good for v6e/v7x MXU, and of 128 for v5e)
_COL_TILE = 1024          # tn target; out_dim <= this collapses the j axis entirely
_K_TILE = 512             # tk target (contraction); tail handled by in-kernel masking
_VMEM_LIMIT = 48 * 1024 * 1024   # fits v7x 64 MiB/TC; >> worst-case footprint (~21 MiB f32 @ 1024 tiles)


def _select_k_tile(in_dim, target=_K_TILE, quantum=128):
    """Contraction tile: full dim if small, else an exact divisor if one exists,
    else `target` (partial last block handled by in-kernel masking)."""
    if in_dim <= target:
        return in_dim
    t = (target // quantum) * quantum
    while t >= quantum:
        if in_dim % t == 0:
            return t
        t -= quantum
    return (target // quantum) * quantum


def _bytes(a):
    return a.size * a.dtype.itemsize


def _lora_linear_kernel(x_ref, wo_ref, b_ref, wd_ref, wu_ref, o_ref,
                        acc_ref, down_ref, *, lora_scale, k_rem, tk):
    # x_ref:   (tm, tk)   activation tile
    # wo_ref:  (tk, tn)   original weight tile (transposed vs torch)
    # b_ref:   (1,  tn)   original bias tile
    # wd_ref:  (tk, r)    lora_down weight tile
    # wu_ref:  (r,  tn)   lora_up weight tile (unscaled)
    # o_ref:   (tm, tn)   output tile
    # acc_ref: (tm, tn)   f32 accumulator for the base matmul (reset per j)
    # down_ref:(tm, r)    f32 LoRA down accumulator (computed at j==0, reused for j>0)
    j = pl.program_id(1)
    k = pl.program_id(2)
    nk = pl.num_programs(2)

    @pl.when(k == 0)
    def _():
        acc_ref[...] = jnp.zeros_like(acc_ref)

    @pl.when((k == 0) & (j == 0))
    def _():
        down_ref[...] = jnp.zeros_like(down_ref)

    x = x_ref[...]
    wo = wo_ref[...]

    if k_rem:  # static: in_dim % tk != 0 -> mask the padded tail of the last K block
        valid = jnp.where(k == nk - 1, k_rem, tk)
        tm, tn = x.shape[0], wo.shape[1]
        x = jnp.where(jax.lax.broadcasted_iota(jnp.int32, (tm, tk), 1) < valid, x, 0)
        wo = jnp.where(jax.lax.broadcasted_iota(jnp.int32, (tk, tn), 0) < valid, wo, 0)

    acc_ref[...] += jnp.dot(x, wo, preferred_element_type=jnp.float32)

    # LoRA down projection depends only on (i, k): compute it once per row tile
    # (at j == 0) and reuse the persistent scratch for the remaining column tiles.
    @pl.when(j == 0)
    def _():
        wd = wd_ref[...]
        if k_rem:
            r = wd.shape[1]
            wd = jnp.where(jax.lax.broadcasted_iota(jnp.int32, (tk, r), 0) < valid, wd, 0)
        down_ref[...] += jnp.dot(x, wd, preferred_element_type=jnp.float32)

    @pl.when(k == nk - 1)
    def _():
        # Apply multiplier*scale to the f32 accumulator (tiny (tm, r) VPU mul).
        down = down_ref[...] * lora_scale
        up = jnp.dot(down.astype(wu_ref.dtype), wu_ref[...],
                     preferred_element_type=jnp.float32)
        o_ref[...] = (acc_ref[...] + b_ref[...].astype(jnp.float32) + up
                      ).astype(o_ref.dtype)


def _base_linear_kernel(x_ref, w_ref, b_ref, o_ref, acc_ref, *, k_rem, tk):
    # Folded fast path: y = x @ W_eff + b
    k = pl.program_id(2)
    nk = pl.num_programs(2)

    @pl.when(k == 0)
    def _():
        acc_ref[...] = jnp.zeros_like(acc_ref)

    x = x_ref[...]
    w = w_ref[...]
    if k_rem:
        valid = jnp.where(k == nk - 1, k_rem, tk)
        tm, tn = x.shape[0], w.shape[1]
        x = jnp.where(jax.lax.broadcasted_iota(jnp.int32, (tm, tk), 1) < valid, x, 0)
        w = jnp.where(jax.lax.broadcasted_iota(jnp.int32, (tk, tn), 0) < valid, w, 0)

    acc_ref[...] += jnp.dot(x, w, preferred_element_type=jnp.float32)

    @pl.when(k == nk - 1)
    def _():
        o_ref[...] = (acc_ref[...] + b_ref[...].astype(jnp.float32)
                      ).astype(o_ref.dtype)


def lora_linear(x, w_org, b_org, w_down, w_up, *, multiplier, scale,
                tm=None, tn=None, tk=None, fold_weights=False):
    """x: (B, S, in_dim). Weights stored as (in, out) / (in, r) / (r, out).

    fold_weights=True precomputes W_eff = W_org + (multiplier*scale) * W_down @ W_up
    once (static-weight inference fast path; LoRA delta quantized to w_org.dtype)
    and runs a single matmul kernel.

    For v5e, cast x / weights to bf16 before calling (f32 accumulation is kept
    in-kernel via preferred_element_type).
    """
    B, S, in_dim = x.shape
    out_dim = w_org.shape[1]
    r = w_down.shape[1]
    N = B * S
    lora_scale = float(multiplier) * float(scale)

    x2d = x.reshape(N, in_dim)
    b2d = b_org.reshape(1, out_dim)

    # --- tile selection ------------------------------------------------------
    # Row / column tails may be partial (out-of-range rows/cols are masked on
    # writeback).  A partial contraction tail is masked in-kernel (k_rem).
    if tm is None:
        tm = N if N <= _ROW_TILE else _ROW_TILE
    if tn is None:
        tn = out_dim if out_dim <= _COL_TILE else _COL_TILE
    if tk is None:
        tk = _select_k_tile(in_dim)
    k_rem = in_dim % tk

    grid = (pl.cdiv(N, tm), pl.cdiv(out_dim, tn), pl.cdiv(in_dim, tk))
    out_bytes = N * out_dim * jnp.dtype(x.dtype).itemsize

    if fold_weights:
        w_eff = (w_org.astype(jnp.float32)
                 + w_down.astype(jnp.float32)
                 @ (w_up.astype(jnp.float32) * lora_scale)).astype(w_org.dtype)
        ce = pl.CostEstimate(
            flops=2 * N * out_dim * in_dim,
            transcendentals=0,
            bytes_accessed=_bytes(x2d) + _bytes(w_eff) + _bytes(b2d) + out_bytes)
        out2d = pl.pallas_call(
            functools.partial(_base_linear_kernel, k_rem=k_rem, tk=tk),
            out_shape=jax.ShapeDtypeStruct((N, out_dim), x.dtype),
            grid_spec=pltpu.PrefetchScalarGridSpec(
                num_scalar_prefetch=0,
                grid=grid,
                in_specs=[
                    pl.BlockSpec((tm, tk), lambda i, j, k: (i, k)),   # x tile
                    pl.BlockSpec((tk, tn), lambda i, j, k: (k, j)),   # W_eff tile
                    pl.BlockSpec((1, tn), lambda i, j, k: (0, j)),    # bias tile
                ],
                out_specs=pl.BlockSpec((tm, tn), lambda i, j, k: (i, j)),
                scratch_shapes=[pltpu.VMEM((tm, tn), jnp.float32)]),
            compiler_params=pltpu.CompilerParams(
                dimension_semantics=("parallel", "parallel", "arbitrary"),
                vmem_limit_bytes=_VMEM_LIMIT),
            cost_estimate=ce,
        )(x2d, w_eff, b2d)
        return out2d.reshape(B, S, out_dim)

    ce = pl.CostEstimate(
        flops=2 * N * out_dim * in_dim + 2 * N * r * (in_dim + out_dim),
        transcendentals=0,
        bytes_accessed=(_bytes(x2d) + _bytes(w_org) + _bytes(b2d)
                        + _bytes(w_down) + _bytes(w_up) + out_bytes))

    out2d = pl.pallas_call(
        functools.partial(_lora_linear_kernel,
                          lora_scale=lora_scale, k_rem=k_rem, tk=tk),
        out_shape=jax.ShapeDtypeStruct((N, out_dim), x.dtype),
        grid_spec=pltpu.PrefetchScalarGridSpec(
            num_scalar_prefetch=0,
            grid=grid,
            in_specs=[
                pl.BlockSpec((tm, tk), lambda i, j, k: (i, k)),   # x tile
                pl.BlockSpec((tk, tn), lambda i, j, k: (k, j)),   # W_org tile
                pl.BlockSpec((1, tn), lambda i, j, k: (0, j)),    # bias tile
                pl.BlockSpec((tk, r), lambda i, j, k: (k, 0)),    # W_down tile
                pl.BlockSpec((r, tn), lambda i, j, k: (0, j)),    # W_up tile
            ],
            out_specs=pl.BlockSpec((tm, tn), lambda i, j, k: (i, j)),
            scratch_shapes=[pltpu.VMEM((tm, tn), jnp.float32),    # base accumulator
                            pltpu.VMEM((tm, r), jnp.float32)]),   # LoRA down accumulator
        # NOTE: j must be "arbitrary": the down accumulator carries across j
        # (computed at j==0, reused for j>0), so the column axis cannot be
        # sharded across TensorCores (v7x).  Row axis i is safely "parallel".
        compiler_params=pltpu.CompilerParams(
            dimension_semantics=("parallel", "arbitrary", "arbitrary"),
            vmem_limit_bytes=_VMEM_LIMIT),
        cost_estimate=ce,
    )(x2d, w_org, b2d, w_down, w_up)

    return out2d.reshape(B, S, out_dim)


if __name__ == "__main__":
    # ---- test 1: small shapes consistent with the Linear path of the module ----
    B, S = 2, 8
    in_dim, out_dim = 32, 32
    lora_dim = 4
    alpha = 1.0
    multiplier = 1.0
    scale = alpha / lora_dim

    key = jax.random.PRNGKey(0)
    kx, kwo, kb, kwd, kwu = jax.random.split(key, 5)

    x = jax.random.normal(kx, (B, S, in_dim), dtype=jnp.float32)

    # org nn.Linear(in_dim, out_dim): torch weight (out, in) -> stored transposed (in, out).
    lim_o = 1.0 / math.sqrt(in_dim)
    w_org = jax.random.uniform(kwo, (in_dim, out_dim), jnp.float32, -lim_o, lim_o)
    b_org = jax.random.uniform(kb, (out_dim,), jnp.float32, -lim_o, lim_o)

    # lora_down: kaiming_uniform(a=sqrt(5)) over torch shape (r, in) -> bound = 1/sqrt(in).
    lim_d = 1.0 / math.sqrt(in_dim)
    w_down = jax.random.uniform(kwd, (in_dim, lora_dim), jnp.float32, -lim_d, lim_d)

    # lora_up is zero-initialized in the module; use small random values here so the
    # LoRA branch of the kernel is actually exercised (forward semantics unchanged).
    w_up = 0.01 * jax.random.normal(kwu, (lora_dim, out_dim), dtype=jnp.float32)

    out = lora_linear(x, w_org, b_org, w_down, w_up,
                      multiplier=multiplier, scale=scale)
    out = jax.block_until_ready(out)

    ref = (x @ w_org + b_org) + (x @ w_down) @ w_up * (multiplier * scale)
    assert out.shape == (B, S, out_dim)
    assert jnp.allclose(out, ref, atol=1e-5, rtol=1e-5), "mismatch vs reference"

    # Folded fast path (static-weight inference): same math, single matmul kernel.
    out_f = lora_linear(x, w_org, b_org, w_down, w_up,
                        multiplier=multiplier, scale=scale, fold_weights=True)
    out_f = jax.block_until_ready(out_f)
    assert jnp.allclose(out_f, ref, atol=1e-4, rtol=1e-4), "folded path mismatch"

    # ---- test 2: tiled grid (rows x cols x K) with j>1 (down-proj reuse across
    #              column tiles) and a partial K tail (in-kernel masking) ----
    B2, S2, in2, out2, r2 = 2, 128, 320, 384, 8      # N=256; K tail: 320 % 128 = 64
    k2 = jax.random.split(jax.random.PRNGKey(1), 5)
    x2 = jax.random.normal(k2[0], (B2, S2, in2), jnp.float32)
    w_org2 = jax.random.normal(k2[1], (in2, out2), jnp.float32) / math.sqrt(in2)
    b_org2 = 0.1 * jax.random.normal(k2[2], (out2,), jnp.float32)
    w_down2 = jax.random.normal(k2[3], (in2, r2), jnp.float32) / math.sqrt(in2)
    w_up2 = 0.01 * jax.random.normal(k2[4], (r2, out2), jnp.float32)
    scale2 = alpha / r2

    out_t = lora_linear(x2, w_org2, b_org2, w_down2, w_up2,
                        multiplier=multiplier, scale=scale2,
                        tm=128, tn=128, tk=128)   # grid (2, 3, 3), k_rem=64
    out_t = jax.block_until_ready(out_t)
    ref_t = (x2 @ w_org2 + b_org2) + (x2 @ w_down2) @ w_up2 * (multiplier * scale2)
    assert jnp.allclose(out_t, ref_t, atol=2e-4, rtol=2e-4), "tiled-grid mismatch"

    out_tf = lora_linear(x2, w_org2, b_org2, w_down2, w_up2,
                         multiplier=multiplier, scale=scale2,
                         tm=128, tn=128, tk=128, fold_weights=True)
    out_tf = jax.block_until_ready(out_tf)
    assert jnp.allclose(out_tf, ref_t, atol=2e-4, rtol=2e-4), "tiled folded mismatch"

    # ---- test 3: default (large-tile) selection path on a mid-size shape ----
    B3, S3, in3, out3, r3 = 1, 512, 640, 768, 16     # N=512; tn=out_dim -> j collapses
    k3 = jax.random.split(jax.random.PRNGKey(2), 5)
    x3 = jax.random.normal(k3[0], (B3, S3, in3), jnp.float32)
    w_org3 = jax.random.normal(k3[1], (in3, out3), jnp.float32) / math.sqrt(in3)
    b_org3 = 0.1 * jax.random.normal(k3[2], (out3,), jnp.float32)
    w_down3 = jax.random.normal(k3[3], (in3, r3), jnp.float32) / math.sqrt(in3)
    w_up3 = 0.01 * jax.random.normal(k3[4], (r3, out3), jnp.float32)
    scale3 = alpha / r3

    out_d = lora_linear(x3, w_org3, b_org3, w_down3, w_up3,
                        multiplier=multiplier, scale=scale3)
    out_d = jax.block_until_ready(out_d)
    ref_d = (x3 @ w_org3 + b_org3) + (x3 @ w_down3) @ w_up3 * (multiplier * scale3)
    assert jnp.allclose(out_d, ref_d, atol=3e-4, rtol=3e-4), "default-tile mismatch"

    # TODO(synk): Conv2d org_module path (lora_down = KxK conv, lora_up = 1x1 conv)
    # not implemented here; the Linear path is the canonical LoRA hot path.
    print("KERNEL_OK")
</pallas_src>

<mosaic_0001>
module attributes {stable_mosaic.version = 11 : i64} {
  func.func @_lora_linear_kernel(%arg0: i32, %arg1: i32, %arg2: i32, %arg3: memref<16x32xf32, #tpu.memory_space<vmem>>, %arg4: memref<32x32xf32, #tpu.memory_space<vmem>>, %arg5: memref<1x32xf32, #tpu.memory_space<vmem>>, %arg6: memref<32x4xf32, #tpu.memory_space<vmem>>, %arg7: memref<4x32xf32, #tpu.memory_space<vmem>>, %arg8: memref<16x32xf32, #tpu.memory_space<vmem>>, %arg9: memref<16x32xf32, #tpu.memory_space<vmem>>, %arg10: memref<16x4xf32, #tpu.memory_space<vmem>>) attributes {dimension_semantics = [#tpu.dimension_semantics<parallel>, #tpu.dimension_semantics<arbitrary>, #tpu.dimension_semantics<arbitrary>], iteration_bounds = array<i64: 1, 1, 1>, scalar_prefetch = 0 : i64, scratch_operands = 2 : i64, tpu.core_type = #tpu.core_type<tc>, window_params = [{transform_indices = @transform_0, window_bounds = array<i64: 16, 32>}, {transform_indices = @transform_1, window_bounds = array<i64: 32, 32>}, {transform_indices = @transform_2, window_bounds = array<i64: 1, 32>}, {transform_indices = @transform_3, window_bounds = array<i64: 32, 4>}, {transform_indices = @transform_4, window_bounds = array<i64: 4, 32>}, {transform_indices = @transform_5, window_bounds = array<i64: 16, 32>}]} {
    %c0_i32 = arith.constant 0 : i32
    %0 = arith.cmpi eq, %arg2, %c0_i32 : i32
    %1 = arith.extui %0 : i1 to i32
    %c0_i32_0 = arith.constant 0 : i32
    %2 = arith.cmpi ne, %1, %c0_i32_0 : i32
    scf.if %2 {
      %cst_15 = arith.constant 0.000000e+00 : f32
      %20 = vector.broadcast %cst_15 : f32 to vector<16x32xf32>
      %c0_16 = arith.constant 0 : index
      %c0_17 = arith.constant 0 : index
      %21 = vector.load %arg9[%c0_16, %c0_17] : memref<16x32xf32, #tpu.memory_space<vmem>>, vector<16x32xf32>
      tpu.vector_store %arg9[%c0_16, %c0_17], %20 {strides = array<i32>} : memref<16x32xf32, #tpu.memory_space<vmem>>, vector<16x32xf32>,
    } else {
    }
    %c0_i32_1 = arith.constant 0 : i32
    %3 = arith.cmpi eq, %arg2, %c0_i32_1 : i32
    %c0_i32_2 = arith.constant 0 : i32
    %4 = arith.cmpi eq, %arg1, %c0_i32_2 : i32
    %5 = arith.andi %3, %4 : i1
    %6 = arith.extui %5 : i1 to i32
    %c0_i32_3 = arith.constant 0 : i32
    %7 = arith.cmpi ne, %6, %c0_i32_3 : i32
    scf.if %7 {
      %cst_15 = arith.constant 0.000000e+00 : f32
      %20 = vector.broadcast %cst_15 : f32 to vector<16x4xf32>
      %c0_16 = arith.constant 0 : index
      %c0_17 = arith.constant 0 : index
      %21 = vector.load %arg10[%c0_16, %c0_17] : memref<16x4xf32, #tpu.memory_space<vmem>>, vector<16x4xf32>
      tpu.vector_store %arg10[%c0_16, %c0_17], %20 {strides = array<i32>} : memref<16x4xf32, #tpu.memory_space<vmem>>, vector<16x4xf32>,
    } else {
    }
    %c0 = arith.constant 0 : index
    %c0_4 = arith.constant 0 : index
    %8 = vector.load %arg3[%c0, %c0_4] : memref<16x32xf32, #tpu.memory_space<vmem>>, vector<16x32xf32>
    %c0_5 = arith.constant 0 : index
    %c0_6 = arith.constant 0 : index
    %9 = vector.load %arg4[%c0_5, %c0_6] : memref<32x32xf32, #tpu.memory_space<vmem>>, vector<32x32xf32>
    %c0_7 = arith.constant 0 : index
    %c0_8 = arith.constant 0 : index
    %10 = vector.load %arg9[%c0_7, %c0_8] : memref<16x32xf32, #tpu.memory_space<vmem>>, vector<16x32xf32>
    %cst = arith.constant dense<0.000000e+00> : vector<16x32xf32>
    %11 = tpu.matmul %8, %9, %cst {dimension_numbers = #tpu.dot_dimension_numbers<[1], [0], [0], [1], [0, 0, 1, 1], [], []>} : vector<16x32xf32>, vector<32x32xf32>, vector<16x32xf32> -> vector<16x32xf32>
    %12 = arith.addf %10, %11 : vector<16x32xf32>
    %c0_9 = arith.constant 0 : index
    %c0_10 = arith.constant 0 : index
    %13 = vector.load %arg9[%c0_9, %c0_10] : memref<16x32xf32, #tpu.memory_space<vmem>>, vector<16x32xf32>
    tpu.vector_store %arg9[%c0_9, %c0_10], %12 {strides = array<i32>} : memref<16x32xf32, #tpu.memory_space<vmem>>, vector<16x32xf32>,
    %c0_i32_11 = arith.constant 0 : i32
    %14 = arith.cmpi eq, %arg1, %c0_i32_11 : i32
    %15 = arith.extui %14 : i1 to i32
    %c0_i32_12 = arith.constant 0 : i32
    %16 = arith.cmpi ne, %15, %c0_i32_12 : i32
    scf.if %16 {
      %c0_15 = arith.constant 0 : index
      %c0_16 = arith.constant 0 : index
      %20 = vector.load %arg6[%c0_15, %c0_16] : memref<32x4xf32, #tpu.memory_space<vmem>>, vector<32x4xf32>
      %c0_17 = arith.constant 0 : index
      %c0_18 = arith.constant 0 : index
      %21 = vector.load %arg10[%c0_17, %c0_18] : memref<16x4xf32, #tpu.memory_space<vmem>>, vector<16x4xf32>
      %cst_19 = arith.constant dense<0.000000e+00> : vector<16x4xf32>
      %22 = tpu.matmul %8, %20, %cst_19 {dimension_numbers = #tpu.dot_dimension_numbers<[1], [0], [0], [1], [0, 0, 1, 1], [], []>} : vector<16x32xf32>, vector<32x4xf32>, vector<16x4xf32> -> vector<16x4xf32>
      %23 = arith.addf %21, %22 : vector<16x4xf32>
      %c0_20 = arith.constant 0 : index
      %c0_21 = arith.constant 0 : index
      %24 = vector.load %arg10[%c0_20, %c0_21] : memref<16x4xf32, #tpu.memory_space<vmem>>, vector<16x4xf32>
      tpu.vector_store %arg10[%c0_20, %c0_21], %23 {strides = array<i32>} : memref<16x4xf32, #tpu.memory_space<vmem>>, vector<16x4xf32>,
    } else {
    }
    %c0_i32_13 = arith.constant 0 : i32
    %17 = arith.cmpi eq, %arg2, %c0_i32_13 : i32
    %18 = arith.extui %17 : i1 to i32
    %c0_i32_14 = arith.constant 0 : i32
    %19 = arith.cmpi ne, %18, %c0_i32_14 : i32
    scf.if %19 {
      %c0_15 = arith.constant 0 : index
      %c0_16 = arith.constant 0 : index
      %20 = vector.load %arg10[%c0_15, %c0_16] : memref<16x4xf32, #tpu.memory_space<vmem>>, vector<16x4xf32>
      %cst_17 = arith.constant 2.500000e-01 : f32
      %21 = vector.broadcast %cst_17 : f32 to vector<16x4xf32>
      %22 = arith.mulf %20, %21 : vector<16x4xf32>
      %c0_18 = arith.constant 0 : index
      %c0_19 = arith.constant 0 : index
      %23 = vector.load %arg7[%c0_18, %c0_19] : memref<4x32xf32, #tpu.memory_space<vmem>>, vector<4x32xf32>
      %cst_20 = arith.constant dense<0.000000e+00> : vector<16x32xf32>
      %24 = tpu.matmul %22, %23, %cst_20 {dimension_numbers = #tpu.dot_dimension_numbers<[1], [0], [0], [1], [0, 0, 1, 1], [], []>} : vector<16x4xf32>, vector<4x32xf32>, vector<16x32xf32> -> vector<16x32xf32>
      %c0_21 = arith.constant 0 : index
      %c0_22 = arith.constant 0 : index
      %25 = vector.load %arg9[%c0_21, %c0_22] : memref<16x32xf32, #tpu.memory_space<vmem>>, vector<16x32xf32>
      %c0_23 = arith.constant 0 : index
      %c0_24 = arith.constant 0 : index
      %26 = vector.load %arg5[%c0_23, %c0_24] : memref<1x32xf32, #tpu.memory_space<vmem>>, vector<1x32xf32>
      %27 = vector.broadcast %26 : vector<1x32xf32> to vector<16x32xf32>
      %28 = arith.addf %25, %27 : vector<16x32xf32>
      %29 = arith.addf %28, %24 : vector<16x32xf32>
      %c0_25 = arith.constant 0 : index
      %c0_26 = arith.constant 0 : index
      %30 = vector.load %arg8[%c0_25, %c0_26] : memref<16x32xf32, #tpu.memory_space<vmem>>, vector<16x32xf32>
      tpu.vector_store %arg8[%c0_25, %c0_26], %29 {strides = array<i32>} : memref<16x32xf32, #tpu.memory_space<vmem>>, vector<16x32xf32>,
    } else {
    }
    return
  }
  func.func @transform_0(%arg0: i32, %arg1: i32, %arg2: i32) -> (i32, i32) {
    %c0_i32 = arith.constant 0 : i32
    return %arg0, %arg2 : i32, i32
  }
  func.func @transform_1(%arg0: i32, %arg1: i32, %arg2: i32) -> (i32, i32) {
    %c0_i32 = arith.constant 0 : i32
    return %arg2, %arg1 : i32, i32
  }
  func.func @transform_2(%arg0: i32, %arg1: i32, %arg2: i32) -> (i32, i32) {
    %c0_i32 = arith.constant 0 : i32
    %c0_i32_0 = arith.constant 0 : i32
    return %c0_i32, %arg1 : i32, i32
  }
  func.func @transform_3(%arg0: i32, %arg1: i32, %arg2: i32) -> (i32, i32) {
    %c0_i32 = arith.constant 0 : i32
    %c0_i32_0 = arith.constant 0 : i32
    return %arg2, %c0_i32 : i32, i32
  }
  func.func @transform_4(%arg0: i32, %arg1: i32, %arg2: i32) -> (i32, i32) {
    %c0_i32 = arith.constant 0 : i32
    %c0_i32_0 = arith.constant 0 : i32
    return %c0_i32, %arg1 : i32, i32
  }
  func.func @transform_5(%arg0: i32, %arg1: i32, %arg2: i32) -> (i32, i32) {
    %c0_i32 = arith.constant 0 : i32
    return %arg0, %arg1 : i32, i32
  }
}

</mosaic_0001>

<bundles_post_ra>
// kernel: tpu_custom_call.1
= control target key start
LH: loop header
LB: loop body
LE: loop exit
PB: predicated region body
PF: predicated region fallthrough
CT: control target
= control target key end

     0   :  { %10 = vsyncpa [#allocation5], 0  ;;  %s589_s0 = inlined_call_operand.hbm [shape: f32[16,32], index: 0, kind: input, shape index: {}]   ;;  %s590_s1 = inlined_call_operand.vmem [shape: f32[32,32], index: 1, kind: input, shape index: {}]   ;;  %s591_s2 = inlined_call_operand.vmem [shape: f32[1,32], index: 2, kind: input, shape index: {}]   ;;  %s592_s3 = inlined_call_operand.vmem [shape: f32[32,4], index: 3, kind: input, shape index: {}]   ;;  %s593_s4 = inlined_call_operand.vmem [shape: f32[4,32], index: 4, kind: input, shape index: {}]   ;;  %s594_s5 = inlined_call_operand.hbm [shape: f32[16,32], index: 5, kind: output, shape index: {}]  }
   0x1   :  { %11 = vsyncpa [#allocation6], 0  ;;  %s478_s18 = smov [#allocation4]   ;;  %s430_s22 = scalar_lea.hbm %s589_s0, 256 }
   0x2   :  { %s17_s19 = sshll.u32 %s478_s18, 4  ;;  %p431_p0 = scmp.ne.s32.totalorder %s589_s0, %s430_s22  ;;  %s18_s19 = int_to_ptr.vmem [resolvable:$true] %s17_s19 }
   0x3   :  { %p434_p1 = scmp.lt.u32.totalorder %s430_s22, %s589_s0 }
   0x5   :  { %p436_p2 = pnand %p434_p1, %p431_p0 }
   0x7   :  { %439 = shalt.err (!%p436_p2)
}
   0x8   :  { %s440_s27 = scalar_lea.vmem %s18_s19, 256  ;;  %p445_p4 = scmp.lt.s32.totalorder %s18_s19, %s18_s19 }
   0x9   :  { %p441_p3 = scmp.ne.s32.totalorder %s18_s19, %s440_s27  ;;  %p446_p5 = scmp.lt.s32.totalorder %s440_s27, %s440_s27 }
   0xb   :  { %p447_p6 = por %p446_p5, %p445_p4 }
   0xd   :  { %p448_p7 = pnand %p447_p6, %p441_p3 }
   0xf   :  { %451 = shalt.err (!%p448_p7)
}
  0x10   :  { %s479_s28 = smov 128   ;;  %s480_s29 = smov 8  }
  0x11   :  { %23 = dma.hbm_to_vmem [thread:$0]  %s589_s0, 256, %s18_s19, [#allocation5], %s479_s28, %s479_s28, %s480_s29  }
  0x12   :  { %474 = dma.done.wait [#allocation5], 256  }
  0x13   :  { %475 = vsyncadd [#allocation5], 4294967040  ;;  %vm39_vm0 = vcmask 261120   ;;  %vm47_vm1 = vcmask 31744   ;;  %v481_v0 = vmov 0.0   ;;  %v147_v1 = vld [vmem:[%s592_s3] sm:$0xff] }
  0x14   :  { %49 = vst.msk [vmem:[#allocation3 + $0x8] sm:$0xff] %vm47_vm1, %v481_v0  ;;  %48 = vst.msk [vmem:[#allocation3] sm:$0xff] %vm47_vm1, %v481_v0  ;;  %v148_v2 = vld [vmem:[%s592_s3 + $0x8] sm:$0xff]  ;;  %v149_v3 = vld [vmem:[%s592_s3 + $0x10] sm:$0xff]  ;;  %vm248_vm2 = vcmask 1043456   ;;  %s482_s23 = smov [#allocation7]  }
  0x15   :  { %40 = vst.msk [vmem:[#allocation2] sm:$0xff] %vm39_vm0, %v481_v0  ;;  %41 = vst.msk [vmem:[#allocation2 + $0x8] sm:$0xff] %vm39_vm0, %v481_v0  ;;  %v417_v4 = vpack.c.bf16 %v148_v2, %v147_v1  ;;  %v150_v5 = vld [vmem:[%s592_s3 + $0x18] sm:$0xff]  ;;  %v50_v6 = vld [vmem:[#allocation4] sm:$0xff]  ;;  %s347_s24 = sshll.u32 %s482_s23, 4  ;;  %s348_s24 = int_to_ptr.vmem [resolvable:$true] %s347_s24 }
  0x16   :  { %v421_v7 = vpack.c.bf16 %v150_v5, %v149_v3  ;;  %401 = vmatprep.mubr.msk.f32.mxu1 %vm39_vm0, %v50_v6  ;;  %v52_v8 = vld [vmem:[%s590_s1] sm:$0xff]  ;;  %v53_v9 = vld [vmem:[%s590_s1 + $0x8] sm:$0xff]  ;;  %v54_v10 = vld [vmem:[%s590_s1 + $0x10] sm:$0xff]  ;;  %390 = vmatprep.mubr.msk.f32.mxu0 %vm39_vm0, %v50_v6  ;;  %s452_s25 = scalar_lea.vmem %s348_s24, 256  ;;  %p457_p9 = scmp.lt.s32.totalorder %s348_s24, %s348_s24 }
  0x17   :  { %418 = vmatprep.subr.bf16.mxu1 %v417_v4  ;;  %v409_v11 = vpack.c.bf16 %v53_v9, %v52_v8  ;;  %v55_v12 = vld [vmem:[%s590_s1 + $0x18] sm:$0xff]  ;;  %v51_v14 = vld [vmem:[#allocation4 + $0x8] sm:$0xff]  ;;  %v240_v15 = vld [vmem:[%s593_s4] sm:$0xf]  ;;  %p453_p8 = scmp.ne.s32.totalorder %s348_s24, %s452_s25  ;;  %p458_p10 = scmp.lt.s32.totalorder %s452_s25, %s452_s25 }
  0x18   :  { %420 = vmatpush3.bf16.msra.mxu1 %v417_v4  ;;  %v413_v13 = vpack.c.bf16 %v55_v12, %v54_v10  ;;  %v366_v33 = vld [vmem:[%s591_s2] ss:$0 sm:$0xff] }
  0x19   :  { %422 = vmatprep.subr.bf16.mxu1 %v421_v7  ;;  %410 = vmatprep.subr.bf16.mxu0 %v409_v11  ;;  %p459_p11 = por %p458_p10, %p457_p9 }
  0x1a   :  { %412 = vmatpush3.bf16.msra.mxu0 %v409_v11 }
  0x1b   :  { %414 = vmatprep.subr.bf16.mxu0 %v413_v13  ;;  %v152_v16 = vld [vmem:[#allocation3 + $0x8] sm:$0xff]  ;;  %v151_v17 = vld [vmem:[#allocation3] sm:$0xff]  ;;  %p460_p12 = pnand %p459_p11, %p453_p8 }
  0x1c   :  { %424 = vmatpush3.bf16.msra.mxu1 %v421_v7  ;;  %v57_v19 = vld [vmem:[#allocation2 + $0x8] sm:$0xff]  ;;  %v56_v22 = vld [vmem:[#allocation2] sm:$0xff] }
  0x1e   :  { %416 = vmatpush3.bf16.msra.mxu0 %v413_v13 }
  0x1f   :  { %402 = vmatmul.mubr.msk.f32.vlgmr.msra.gmra.mrb[0].mxu1 %vm39_vm0, %v51_v14  ;;  %404 = vmatprep.subr.msk.mxu0 %vm248_vm2, %v240_v15 }
  0x21   :  { %391 = vmatmul.mubr.msk.f32.vlgmr.msra.gmra.mrb[0].mxu0 %vm39_vm0, %v51_v14 }
  0x22   :  { %405 = vmatpush3.msk.msra.mxu0 %vm248_vm2, %v240_v15 }
  0xf2   :  { %v403_v18 = vpop.f32.mrb[0].mxu1 }
  0xf3   :  { %v229_v20 = vadd.f32 %v403_v18, %v152_v16  ;;  %v219_v21 = vpop.f32.mrb[1].mxu1 }
  0xf4   :  { %v228_v23 = vadd.f32 %v219_v21, %v151_v17  ;;  %v392_v24 = vpop.f32.mrb[0].mxu0 }
  0xf5   :  { %232 = vst.msk [vmem:[#allocation3 + $0x8] sm:$0xff] %vm47_vm1, %v229_v20  ;;  %v141_v25 = vadd.f32 %v392_v24, %v57_v19  ;;  %v131_v26 = vpop.f32.mrb[1].mxu0 }
  0xf6   :  { %231 = vst.msk [vmem:[#allocation3] sm:$0xff] %vm47_vm1, %v228_v23  ;;  %v140_v27 = vadd.f32 %v131_v26, %v56_v22 }
  0xf7   :  { %143 = vst.msk [vmem:[#allocation2 + $0x8] sm:$0xff] %vm39_vm0, %v141_v25 }
  0xf8   :  { %142 = vst.msk [vmem:[#allocation2] sm:$0xff] %vm39_vm0, %v140_v27 }
  0xfc   :  { %v237_v28 = vld [vmem:[#allocation3 + $0x8] sm:$0xff] }
  0xfd   :  { %v236_v29 = vld [vmem:[#allocation3] sm:$0xff]  ;;  %v239_v31 = vmul.f32 0.25, %v237_v28 }
  0xfe   :  { %v238_v30 = vmul.f32 0.25, %v236_v29  ;;  %v328_v32 = vld [vmem:[#allocation2 + $0x8] sm:$0xff] }
  0xff   :  { %v327_v34 = vld [vmem:[#allocation2] sm:$0xff]  ;;  %v337_v35 = vadd.f32 %v366_v33, %v328_v32 }
 0x100   :  { %406 = vmatprep.mubr.msk.f32.mxu0 %vm47_vm1, %v238_v30  ;;  %v336_v36 = vadd.f32 %v366_v33, %v327_v34 }
 0x101   :  { %407 = vmatmul.mubr.msk.f32.vlgmr.msra.gmra.mrb[2].mxu0 %vm47_vm1, %v239_v31 }
 0x1d4   :  { %v408_v37 = vpop.f32.mrb[2].mxu0 }
 0x1d5   :  { %v339_v38 = vadd.f32 %v408_v37, %v337_v35  ;;  %v318_v39 = vpop.f32.mrb[3].mxu0 }
 0x1d6   :  { %v338_v40 = vadd.f32 %v336_v36, %v318_v39 }
 0x1d7   :  { %341 = vst.msk [vmem:[#allocation7 + $0x8] sm:$0xff] %vm39_vm0, %v339_v38 }
 0x1d8   :  { %340 = vst.msk [vmem:[#allocation7] sm:$0xff] %vm39_vm0, %v338_v40 }
 0x1d9   :  { %463 = shalt.err (!%p460_p12)
}
 0x1da   :  { %s464_s27 = scalar_lea.hbm %s594_s5, 256 }
 0x1db   :  { %p465_p13 = scmp.ne.s32.totalorder %s594_s5, %s464_s27  ;;  %p468_p0 = scmp.lt.u32.totalorder %s464_s27, %s594_s5 }
 0x1dd   :  { %p470_p1 = pnand %p468_p0, %p465_p13 }
 0x1df   :  { %473 = shalt.err (!%p470_p1)
}
 0x1e0   :  { %353 = dma.vmem_to_hbm [thread:$0]  %s348_s24, 256, %s594_s5, [#allocation6], %s479_s28, %s479_s28, %s480_s29  }
 0x1e1   :  { %476 = dma.done.wait [#allocation6], 256  }
 0x1e2   :  { %477 = vsyncadd [#allocation6], 4294967040 }
 0x1e3   :  { %357 = vsyncpa [#allocation5], 1 }
 0x1e4   :  { %358 = vsyncpa [#allocation6], 1 }

</bundles_post_ra>
